<compile_context>
chip_gen: v5e
topology: v5e:2x2
jax: 0.10.0
libtpu: 0.0.40
codegen_flags: <defaults>
</compile_context>

<pallas_src>
import functools

import jax
import jax.numpy as jnp
import numpy as np
from jax.experimental import pallas as pl
from jax.experimental.pallas import tpu as pltpu

BN_EPS = 1e-5
TILE_M = 256          # N*H*W rows per grid step (multiple of 8)
LANES = 128           # lane width: output channels padded to a multiple of this

_COMPILER_PARAMS = pltpu.CompilerParams(
    dimension_semantics=("parallel",),          # independent row tiles
    vmem_limit_bytes=64 * 1024 * 1024,
)


def _round_up(x, m):
    return ((x + m - 1) // m) * m


# ---------------------------------------------------------------------------
# Pass 1: 3x3 conv as a single folded matmul + per-tile BN partial sums
# ---------------------------------------------------------------------------
def conv_stats_kernel(p_ref, w_ref, y_ref, stats_ref):
    # p_ref:     (TILE_M, 9*Cin)   im2col rows for this tile
    # w_ref:     (9*Cin, Coutp)    folded conv weight (same block every step)
    # y_ref:     (TILE_M, Coutp)   conv output tile (f32)
    # stats_ref: (8, Coutp)        row 0 = sum, row 1 = sum of squares
    y = jnp.dot(p_ref[...], w_ref[...], preferred_element_type=jnp.float32)
    y_ref[...] = y
    s = jnp.sum(y, axis=0, keepdims=True)
    ssq = jnp.sum(y * y, axis=0, keepdims=True)
    pad = jnp.zeros((6, y.shape[1]), jnp.float32)
    stats_ref[...] = jnp.concatenate([s, ssq, pad], axis=0)


# ---------------------------------------------------------------------------
# Pass 2: BatchNorm (training-mode batch statistics) + ReLU
# ---------------------------------------------------------------------------
def bn_relu_kernel(y_ref, mean_ref, var_ref, gamma_ref, beta_ref, o_ref):
    inv = jax.lax.rsqrt(var_ref[...] + BN_EPS)           # EUP rsqrt (free slot)
    scale = gamma_ref[...] * inv
    shift = beta_ref[...] - mean_ref[...] * scale
    o_ref[...] = jnp.maximum(y_ref[...] * scale + shift, 0.0).astype(o_ref.dtype)


def conv_bn_relu(x_nhwc, w_hwio, gamma, beta, *, tile_m=TILE_M,
                 compute_dtype=jnp.float32):
    """One Conv2dReLU block (3x3, stride 1, pad 1, bias=False) via Pallas."""
    N, H, W, Cin = x_nhwc.shape
    Cout = w_hwio.shape[-1]
    NHW = N * H * W
    K = 9 * Cin
    Coutp = _round_up(Cout, LANES)

    tile_m = min(tile_m, _round_up(NHW, 8))
    num_tiles = (NHW + tile_m - 1) // tile_m
    M_pad = num_tiles * tile_m

    # im2col: channel order (ky, kx, cin) matches w_hwio.reshape(9*Cin, Cout).
    # TODO(synk): this still materializes a 9x copy of the activation in HBM;
    # next step is overlapping-window DMA straight from the padded NHWC tensor.
    xp = jnp.pad(x_nhwc, ((0, 0), (1, 1), (1, 1), (0, 0)))
    taps = [xp[:, dy:dy + H, dx:dx + W, :] for dy in range(3) for dx in range(3)]
    patches = jnp.concatenate(taps, axis=-1).reshape(NHW, K)
    if M_pad != NHW:                 # zero rows are harmless: conv(0) = 0 -> no
        patches = jnp.pad(patches, ((0, M_pad - NHW), (0, 0)))  # effect on sums
    patches = patches.astype(compute_dtype)

    w = w_hwio.reshape(K, Cout)
    w = jnp.pad(w, ((0, 0), (0, Coutp - Cout))).astype(compute_dtype)
    gamma_p = jnp.pad(gamma, (0, Coutp - Cout), constant_values=1.0).reshape(1, Coutp)
    beta_p = jnp.pad(beta, (0, Coutp - Cout)).reshape(1, Coutp)

    conv_out, stats = pl.pallas_call(
        conv_stats_kernel,
        grid=(num_tiles,),
        in_specs=[
            pl.BlockSpec((tile_m, K), lambda i: (i, 0)),
            pl.BlockSpec((K, Coutp), lambda i: (0, 0)),
        ],
        out_specs=[
            pl.BlockSpec((tile_m, Coutp), lambda i: (i, 0)),
            pl.BlockSpec((None, 8, Coutp), lambda i: (i, 0, 0)),
        ],
        out_shape=(
            jax.ShapeDtypeStruct((M_pad, Coutp), jnp.float32),
            jax.ShapeDtypeStruct((num_tiles, 8, Coutp), jnp.float32),
        ),
        compiler_params=_COMPILER_PARAMS,
    )(patches, w)

    # Tiny cross-tile reduction -> exact batch statistics over all N*H*W rows.
    s_tot = jnp.sum(stats[:, 0, :], axis=0)
    ssq_tot = jnp.sum(stats[:, 1, :], axis=0)
    mean = (s_tot / float(NHW)).reshape(1, Coutp)
    # E[x^2] - mean^2 (one pass over the conv output); clamp f32 cancellation.
    var = jnp.maximum(ssq_tot / float(NHW) - mean[0] * mean[0], 0.0).reshape(1, Coutp)

    out = pl.pallas_call(
        bn_relu_kernel,
        grid=(num_tiles,),
        in_specs=[
            pl.BlockSpec((tile_m, Coutp), lambda i: (i, 0)),
            pl.BlockSpec((1, Coutp), lambda i: (0, 0)),
            pl.BlockSpec((1, Coutp), lambda i: (0, 0)),
            pl.BlockSpec((1, Coutp), lambda i: (0, 0)),
            pl.BlockSpec((1, Coutp), lambda i: (0, 0)),
        ],
        out_specs=pl.BlockSpec((tile_m, Coutp), lambda i: (i, 0)),
        out_shape=jax.ShapeDtypeStruct((M_pad, Coutp), jnp.float32),
        compiler_params=_COMPILER_PARAMS,
    )(conv_out, mean, var, gamma_p, beta_p)

    return out[:NHW, :Cout].reshape(N, H, W, Cout)


# ---------------------------------------------------------------------------
# Bilinear upsample (align_corners=True) as two small matmuls, NCHW -> NHWC.
# ---------------------------------------------------------------------------
def _bilinear_matrix(out_size, in_size):
    i = np.arange(out_size, dtype=np.float64)
    src = i * (in_size - 1) / (out_size - 1) if out_size > 1 else np.zeros_like(i)
    i0 = np.clip(np.floor(src).astype(np.int64), 0, in_size - 1)
    i1 = np.clip(i0 + 1, 0, in_size - 1)
    w1 = src - i0
    w0 = 1.0 - w1
    m = np.zeros((out_size, in_size), dtype=np.float32)
    m[np.arange(out_size), i0] += w0
    m[np.arange(out_size), i1] += w1
    return jnp.asarray(m)


def _upsample_to_nhwc(x_nchw, h_out, w_out):
    # TODO(synk): resampling stays in XLA glue (not the Pallas hot path); it is
    # expressed as two small matmuls and fuses with the concat/layout change.
    _, _, h_in, w_in = x_nchw.shape
    mh = _bilinear_matrix(h_out, h_in)
    mw = _bilinear_matrix(w_out, w_in)
    return jnp.einsum("oh,nchw,pw->nopc", mh, x_nchw, mw)


# ---------------------------------------------------------------------------
# DecoderBlock forward
# ---------------------------------------------------------------------------
def decoder_block(x, skip, params, *, compute_dtype=jnp.float32):
    """x, skip: NCHW float32. Returns NCHW float32."""
    if skip is not None:
        h_out, w_out = skip.shape[-2], skip.shape[-1]
    else:
        h_out, w_out = x.shape[-2] * 2, x.shape[-1] * 2
    xu = _upsample_to_nhwc(x, h_out, w_out)
    if skip is not None:
        xu = jnp.concatenate([xu, jnp.transpose(skip, (0, 2, 3, 1))], axis=-1)
    y = conv_bn_relu(xu, params["w1"], params["g1"], params["b1"],
                     compute_dtype=compute_dtype)
    y = conv_bn_relu(y, params["w2"], params["g2"], params["b2"],
                     compute_dtype=compute_dtype)
    return jnp.transpose(y, (0, 3, 1, 2))


# ---------------------------------------------------------------------------
# Pure-JAX reference (PyTorch semantics: conv + BN(train, biased var) + ReLU)
# ---------------------------------------------------------------------------
def _ref_conv_bn_relu(x_nhwc, w_hwio, gamma, beta):
    y = jax.lax.conv_general_dilated(
        x_nhwc, w_hwio, (1, 1), "SAME",
        dimension_numbers=("NHWC", "HWIO", "NHWC"))
    mean = y.mean(axis=(0, 1, 2))
    var = ((y - mean) ** 2).mean(axis=(0, 1, 2))
    y = (y - mean) * jax.lax.rsqrt(var + BN_EPS) * gamma + beta
    return jnp.maximum(y, 0.0)


def _ref_decoder_block(x, skip, params):
    if skip is not None:
        h_out, w_out = skip.shape[-2], skip.shape[-1]
    else:
        h_out, w_out = x.shape[-2] * 2, x.shape[-1] * 2
    xu = _upsample_to_nhwc(x, h_out, w_out)
    if skip is not None:
        xu = jnp.concatenate([xu, jnp.transpose(skip, (0, 2, 3, 1))], axis=-1)
    y = _ref_conv_bn_relu(xu, params["w1"], params["g1"], params["b1"])
    y = _ref_conv_bn_relu(y, params["w2"], params["g2"], params["b2"])
    return jnp.transpose(y, (0, 3, 1, 2))


# ---------------------------------------------------------------------------
if __name__ == "__main__":
    # DecoderBlock(in_channels=4, skip_channels=4, out_channels=8)
    in_channels, skip_channels, out_channels = 4, 4, 8
    N, H_in, W_in = 2, 8, 8          # low-res decoder input
    H_skip, W_skip = 16, 16          # skip connection resolution (2x upsample)

    key = jax.random.PRNGKey(0)
    k_x, k_s, k_w1, k_w2, k_g1, k_b1, k_g2, k_b2 = jax.random.split(key, 8)

    x = jax.random.normal(k_x, (N, in_channels, H_in, W_in), jnp.float32)
    skip = jax.random.normal(k_s, (N, skip_channels, H_skip, W_skip), jnp.float32)

    cin1 = in_channels + skip_channels
    params = {
        # conv weights stored HWIO (PyTorch OIHW permuted); bias=False
        "w1": 0.1 * jax.random.normal(k_w1, (3, 3, cin1, out_channels), jnp.float32),
        "w2": 0.1 * jax.random.normal(k_w2, (3, 3, out_channels, out_channels), jnp.float32),
        "g1": 1.0 + 0.1 * jax.random.normal(k_g1, (out_channels,), jnp.float32),
        "b1": 0.1 * jax.random.normal(k_b1, (out_channels,), jnp.float32),
        "g2": 1.0 + 0.1 * jax.random.normal(k_g2, (out_channels,), jnp.float32),
        "b2": 0.1 * jax.random.normal(k_b2, (out_channels,), jnp.float32),
    }

    out = jax.block_until_ready(jax.jit(decoder_block)(x, skip, params))
    assert out.shape == (N, out_channels, H_skip, W_skip), out.shape

    ref = jax.block_until_ready(_ref_decoder_block(x, skip, params))
    np.testing.assert_allclose(np.asarray(out), np.asarray(ref), rtol=5e-3, atol=5e-3)

    # bf16 MXU inputs (f32 accumulation) -- recommended on v6e/v7x.
    out_bf16 = jax.block_until_ready(
        jax.jit(functools.partial(decoder_block, compute_dtype=jnp.bfloat16))(
            x, skip, params))
    np.testing.assert_allclose(np.asarray(out_bf16), np.asarray(ref),
                               rtol=5e-2, atol=5e-2)

    print("KERNEL_OK")
</pallas_src>

<mosaic_0001>
module attributes {stable_mosaic.version = 11 : i64} {
  func.func @conv_stats_kernel(%arg0: i32, %arg1: memref<256x72xf32, #tpu.memory_space<vmem>>, %arg2: memref<72x128xf32, #tpu.memory_space<vmem>>, %arg3: memref<256x128xf32, #tpu.memory_space<vmem>>, %arg4: memref<1x8x128xf32, #tpu.memory_space<vmem>>) attributes {dimension_semantics = [#tpu.dimension_semantics<parallel>], iteration_bounds = array<i64: 2>, scalar_prefetch = 0 : i64, scratch_operands = 0 : i64, tpu.core_type = #tpu.core_type<tc>, window_params = [{transform_indices = @transform_0, window_bounds = array<i64: 256, 72>}, {pipeline_mode = #tpu.pipeline_mode<synchronous>, transform_indices = @transform_1, window_bounds = array<i64: 72, 128>}, {transform_indices = @transform_2, window_bounds = array<i64: 256, 128>}, {transform_indices = @transform_3, window_bounds = array<i64: 1, 8, 128>}]} {
    %c0 = arith.constant 0 : index
    %c0_0 = arith.constant 0 : index
    %0 = vector.load %arg1[%c0, %c0_0] : memref<256x72xf32, #tpu.memory_space<vmem>>, vector<256x72xf32>
    %c0_1 = arith.constant 0 : index
    %c0_2 = arith.constant 0 : index
    %1 = vector.load %arg2[%c0_1, %c0_2] : memref<72x128xf32, #tpu.memory_space<vmem>>, vector<72x128xf32>
    %cst = arith.constant dense<0.000000e+00> : vector<256x128xf32>
    %2 = tpu.matmul %0, %1, %cst {dimension_numbers = #tpu.dot_dimension_numbers<[1], [0], [0], [1], [0, 0, 1, 1], [], []>} : vector<256x72xf32>, vector<72x128xf32>, vector<256x128xf32> -> vector<256x128xf32>
    %c0_3 = arith.constant 0 : index
    %c0_4 = arith.constant 0 : index
    %3 = vector.load %arg3[%c0_3, %c0_4] : memref<256x128xf32, #tpu.memory_space<vmem>>, vector<256x128xf32>
    tpu.vector_store %arg3[%c0_3, %c0_4], %2 {strides = array<i32>} : memref<256x128xf32, #tpu.memory_space<vmem>>, vector<256x128xf32>,
    %cst_5 = arith.constant dense<0.000000e+00> : vector<128xf32>
    %4 = vector.multi_reduction <add>, %2, %cst_5 [0] : vector<256x128xf32> to vector<128xf32>
    %5 = vector.shape_cast %4 : vector<128xf32> to vector<1x128xf32>
    %6 = arith.mulf %2, %2 : vector<256x128xf32>
    %cst_6 = arith.constant dense<0.000000e+00> : vector<128xf32>
    %7 = vector.multi_reduction <add>, %6, %cst_6 [0] : vector<256x128xf32> to vector<128xf32>
    %8 = vector.shape_cast %7 : vector<128xf32> to vector<1x128xf32>
    %cst_7 = arith.constant 0.000000e+00 : f32
    %9 = vector.broadcast %cst_7 : f32 to vector<6x128xf32>
    %10 = tpu.concatenate %5, %8, %9 in 0 : vector<1x128xf32>, vector<1x128xf32>, vector<6x128xf32> -> vector<8x128xf32>
    %c0_8 = arith.constant 0 : index
    %c0_9 = arith.constant 0 : index
    %c0_10 = arith.constant 0 : index
    %11 = vector.load %arg4[%c0_8, %c0_9, %c0_10] : memref<1x8x128xf32, #tpu.memory_space<vmem>>, vector<1x8x128xf32>
    %12 = vector.shape_cast %11 : vector<1x8x128xf32> to vector<8x128xf32>
    %13 = vector.shape_cast %10 : vector<8x128xf32> to vector<1x8x128xf32>
    tpu.vector_store %arg4[%c0_8, %c0_9, %c0_10], %13 {strides = array<i32>} : memref<1x8x128xf32, #tpu.memory_space<vmem>>, vector<1x8x128xf32>,
    return
  }
  func.func @transform_0(%arg0: i32) -> (i32, i32) {
    %c0_i32 = arith.constant 0 : i32
    %c0_i32_0 = arith.constant 0 : i32
    return %arg0, %c0_i32 : i32, i32
  }
  func.func @transform_1(%arg0: i32) -> (i32, i32) {
    %c0_i32 = arith.constant 0 : i32
    %c0_i32_0 = arith.constant 0 : i32
    %c0_i32_1 = arith.constant 0 : i32
    return %c0_i32, %c0_i32_0 : i32, i32
  }
  func.func @transform_2(%arg0: i32) -> (i32, i32) {
    %c0_i32 = arith.constant 0 : i32
    %c0_i32_0 = arith.constant 0 : i32
    return %arg0, %c0_i32 : i32, i32
  }
  func.func @transform_3(%arg0: i32) -> (i32, i32, i32) {
    %c0_i32 = arith.constant 0 : i32
    %c0_i32_0 = arith.constant 0 : i32
    %c0_i32_1 = arith.constant 0 : i32
    return %arg0, %c0_i32, %c0_i32_0 : i32, i32, i32
  }
}

module attributes {stable_mosaic.version = 11 : i64} {
  func.func @bn_relu_kernel(%arg0: i32, %arg1: memref<256x128xf32, #tpu.memory_space<vmem>>, %arg2: memref<1x128xf32, #tpu.memory_space<vmem>>, %arg3: memref<1x128xf32, #tpu.memory_space<vmem>>, %arg4: memref<1x128xf32, #tpu.memory_space<vmem>>, %arg5: memref<1x128xf32, #tpu.memory_space<vmem>>, %arg6: memref<256x128xf32, #tpu.memory_space<vmem>>) attributes {dimension_semantics = [#tpu.dimension_semantics<parallel>], iteration_bounds = array<i64: 2>, scalar_prefetch = 0 : i64, scratch_operands = 0 : i64, tpu.core_type = #tpu.core_type<tc>, window_params = [{transform_indices = @transform_0, window_bounds = array<i64: 256, 128>}, {pipeline_mode = #tpu.pipeline_mode<synchronous>, transform_indices = @transform_1, window_bounds = array<i64: 1, 128>}, {pipeline_mode = #tpu.pipeline_mode<synchronous>, transform_indices = @transform_2, window_bounds = array<i64: 1, 128>}, {pipeline_mode = #tpu.pipeline_mode<synchronous>, transform_indices = @transform_3, window_bounds = array<i64: 1, 128>}, {pipeline_mode = #tpu.pipeline_mode<synchronous>, transform_indices = @transform_4, window_bounds = array<i64: 1, 128>}, {transform_indices = @transform_5, window_bounds = array<i64: 256, 128>}]} {
    %c0 = arith.constant 0 : index
    %c0_0 = arith.constant 0 : index
    %0 = vector.load %arg3[%c0, %c0_0] : memref<1x128xf32, #tpu.memory_space<vmem>>, vector<1x128xf32>
    %cst = arith.constant 9.99999974E-6 : f32
    %1 = vector.broadcast %cst : f32 to vector<1x128xf32>
    %2 = arith.addf %0, %1 : vector<1x128xf32>
    %3 = math.rsqrt %2 : vector<1x128xf32>
    %c0_1 = arith.constant 0 : index
    %c0_2 = arith.constant 0 : index
    %4 = vector.load %arg4[%c0_1, %c0_2] : memref<1x128xf32, #tpu.memory_space<vmem>>, vector<1x128xf32>
    %5 = arith.mulf %4, %3 : vector<1x128xf32>
    %c0_3 = arith.constant 0 : index
    %c0_4 = arith.constant 0 : index
    %6 = vector.load %arg5[%c0_3, %c0_4] : memref<1x128xf32, #tpu.memory_space<vmem>>, vector<1x128xf32>
    %c0_5 = arith.constant 0 : index
    %c0_6 = arith.constant 0 : index
    %7 = vector.load %arg2[%c0_5, %c0_6] : memref<1x128xf32, #tpu.memory_space<vmem>>, vector<1x128xf32>
    %8 = arith.mulf %7, %5 : vector<1x128xf32>
    %9 = arith.subf %6, %8 : vector<1x128xf32>
    %c0_7 = arith.constant 0 : index
    %c0_8 = arith.constant 0 : index
    %10 = vector.load %arg1[%c0_7, %c0_8] : memref<256x128xf32, #tpu.memory_space<vmem>>, vector<256x128xf32>
    %11 = vector.broadcast %5 : vector<1x128xf32> to vector<256x128xf32>
    %12 = arith.mulf %10, %11 : vector<256x128xf32>
    %13 = vector.broadcast %9 : vector<1x128xf32> to vector<256x128xf32>
    %14 = arith.addf %12, %13 : vector<256x128xf32>
    %cst_9 = arith.constant 0.000000e+00 : f32
    %15 = vector.broadcast %cst_9 : f32 to vector<256x128xf32>
    %16 = arith.maximumf %14, %15 : vector<256x128xf32>
    %c0_10 = arith.constant 0 : index
    %c0_11 = arith.constant 0 : index
    %17 = vector.load %arg6[%c0_10, %c0_11] : memref<256x128xf32, #tpu.memory_space<vmem>>, vector<256x128xf32>
    tpu.vector_store %arg6[%c0_10, %c0_11], %16 {strides = array<i32>} : memref<256x128xf32, #tpu.memory_space<vmem>>, vector<256x128xf32>,
    return
  }
  func.func @transform_0(%arg0: i32) -> (i32, i32) {
    %c0_i32 = arith.constant 0 : i32
    %c0_i32_0 = arith.constant 0 : i32
    return %arg0, %c0_i32 : i32, i32
  }
  func.func @transform_1(%arg0: i32) -> (i32, i32) {
    %c0_i32 = arith.constant 0 : i32
    %c0_i32_0 = arith.constant 0 : i32
    %c0_i32_1 = arith.constant 0 : i32
    return %c0_i32, %c0_i32_0 : i32, i32
  }
  func.func @transform_2(%arg0: i32) -> (i32, i32) {
    %c0_i32 = arith.constant 0 : i32
    %c0_i32_0 = arith.constant 0 : i32
    %c0_i32_1 = arith.constant 0 : i32
    return %c0_i32, %c0_i32_0 : i32, i32
  }
  func.func @transform_3(%arg0: i32) -> (i32, i32) {
    %c0_i32 = arith.constant 0 : i32
    %c0_i32_0 = arith.constant 0 : i32
    %c0_i32_1 = arith.constant 0 : i32
    return %c0_i32, %c0_i32_0 : i32, i32
  }
  func.func @transform_4(%arg0: i32) -> (i32, i32) {
    %c0_i32 = arith.constant 0 : i32
    %c0_i32_0 = arith.constant 0 : i32
    %c0_i32_1 = arith.constant 0 : i32
    return %c0_i32, %c0_i32_0 : i32, i32
  }
  func.func @transform_5(%arg0: i32) -> (i32, i32) {
    %c0_i32 = arith.constant 0 : i32
    %c0_i32_0 = arith.constant 0 : i32
    return %arg0, %c0_i32 : i32, i32
  }
}

</mosaic_0001>

<bundles_post_ra>
// kernel: decoder_block.4
= control target key start
LH: loop header
LB: loop body
LE: loop exit
PB: predicated region body
PF: predicated region fallthrough
CT: control target
= control target key end

     0   :  { %s773_s12 = smov 0   ;;  %s1040_s0 = inlined_call_operand.vmem [shape: f32[512,72], index: 0, kind: input, shape index: {}]   ;;  %s1041_s1 = inlined_call_operand.vmem [shape: f32[72,128], index: 1, kind: input, shape index: {}]   ;;  %s1042_s2 = inlined_call_operand.vmem [shape: f32[512,128], index: 2, kind: output, shape index: {0}]   ;;  %s1043_s3 = inlined_call_operand.vmem [shape: f32[2,8,128], index: 3, kind: output, shape index: {1}]  }
   0x1 LB: > { %s779_s13 = sadd.s32 4294967295, %s751_s12   ;;  %p670_p0 = scmp.ge.s32.totalorder %s751_s12, 1  ;;  %s751_s12 = sphi %s773_s12, %s14_s12  }
   0x2   : > { %p141_p1 = scmp.lt.s32.totalorder %s751_s12, 3 }
   0x4   : > { %p142_p2 = pnand %p670_p0, %p141_p1 }
   0x5   : > { %s671_s18 = sshll.u32 (!%p142_p2), %s779_s13, 5  ;;  %p181_p4 = scmp.lt.s32.totalorder (!%p142_p2), %s779_s13, 1 }
   0x6   : > { %145 = sbr.rel (%p142_p2) target bundleno = 278 (0x116), region = 28  ;;  %p170_p3 = scmp.lt.s32.totalorder (!%p142_p2), %s671_s18, 63 }
   0xb   : > { %v225_v0 = vld [vmem:[%s1041_s1 + $0x40] sm:$0xff]  ;;  %v224_v1 = vld [vmem:[%s1041_s1 + $0x38] sm:$0xff]  ;;  %v223_v2 = vld [vmem:[%s1041_s1 + $0x30] sm:$0xff]  ;;  %s1045_s18 = smov (!%p170_p3, %s671_s18), 63  ;;  %vm226_vm0 = vcmask 588800   ;;  %s1047_s13 = smov (!%p181_p4, %s779_s13), 1 }
   0xc   : > { %330 = vmatpush.msra.mxu0 %v225_v0  ;;  %710 = vmatpush.msra.mxu1 %v225_v0  ;;  %v222_v3 = vld [vmem:[%s1041_s1 + $0x28] sm:$0xff]  ;;  %v221_v4 = vld [vmem:[%s1041_s1 + $0x20] sm:$0xff]  ;;  %v220_v5 = vld [vmem:[%s1041_s1 + $0x18] sm:$0xff]  ;;  %s672_s27 = sshll.u32 %s1045_s18, 3  ;;  %s675_s15 = sshll.u32 %s1047_s13, 3  ;;  %vm574_vm1 = vcmask 1040384  }
   0xd   : > { %711 = vmatpush.msra.mxu2 %v225_v0  ;;  %712 = vmatpush.msra.mxu3 %v225_v0  ;;  %v219_v6 = vld [vmem:[%s1041_s1 + $0x10] sm:$0xff]  ;;  %v218_v7 = vld [vmem:[%s1041_s1 + $0x8] sm:$0xff]  ;;  %s816_s7 = scalar_lea.vmem %s1040_s0, %s672_s27  ;;  %v217_v8 = vld [vmem:[%s1041_s1] sm:$0xff]  ;;  %s890_s14 = scalar_lea.vmem %s1042_s2, %s672_s27  ;;  %vm576_vm2 = vcmask 1041408  }
   0xe   : > { %331 = vmatpush.msra.mxu0 %v224_v1  ;;  %713 = vmatpush.msra.mxu1 %v224_v1  ;;  %v185_v9 = vld [vmem:[%s816_s7] sm:$0xff]  ;;  %v186_v12 = vld [vmem:[%s816_s7 + $0x8] sm:$0xff]  ;;  %v187_v16 = vld [vmem:[%s816_s7 + $0x10] sm:$0xff]  ;;  %s184_s18 = scalar_lea.vmem %s1043_s3, %s675_s15 }
   0xf   : > { %714 = vmatpush.msra.mxu2 %v224_v1  ;;  %715 = vmatpush.msra.mxu3 %v224_v1  ;;  %v193_v10 = vld [vmem:[%s816_s7 + $0x40] sm:$0xff]  ;;  %v194_v13 = vld [vmem:[%s816_s7 + $0x48] sm:$0xff]  ;;  %v195_v17 = vld [vmem:[%s816_s7 + $0x50] sm:$0xff] }
  0x10   : > { %332 = vmatpush.msra.mxu0 %v223_v2  ;;  %716 = vmatpush.msra.mxu1 %v223_v2  ;;  %v201_v11 = vld [vmem:[%s816_s7 + $0x80] sm:$0xff]  ;;  %v202_v14 = vld [vmem:[%s816_s7 + $0x88] sm:$0xff]  ;;  %v203_v18 = vld [vmem:[%s816_s7 + $0x90] sm:$0xff] }
  0x11   : > { %717 = vmatpush.msra.mxu2 %v223_v2  ;;  %718 = vmatpush.msra.mxu3 %v223_v2  ;;  %v209_v15 = vld [vmem:[%s816_s7 + $0xc0] sm:$0xff]  ;;  %v210_v19 = vld [vmem:[%s816_s7 + $0xc8] sm:$0xff]  ;;  %v188_v20 = vld [vmem:[%s816_s7 + $0x18] sm:$0xff] }
  0x12   : > { %333 = vmatpush.msra.mxu0 %v222_v3  ;;  %719 = vmatpush.msra.mxu1 %v222_v3  ;;  %v196_v21 = vld [vmem:[%s816_s7 + $0x58] sm:$0xff]  ;;  %v211_v23 = vld [vmem:[%s816_s7 + $0xd0] sm:$0xff]  ;;  %v189_v24 = vld [vmem:[%s816_s7 + $0x20] sm:$0xff] }
  0x13   : > { %720 = vmatpush.msra.mxu2 %v222_v3  ;;  %721 = vmatpush.msra.mxu3 %v222_v3  ;;  %v204_v22 = vld [vmem:[%s816_s7 + $0x98] sm:$0xff]  ;;  %v197_v25 = vld [vmem:[%s816_s7 + $0x60] sm:$0xff]  ;;  %v190_v28 = vld [vmem:[%s816_s7 + $0x28] sm:$0xff] }
  0x14   : > { %334 = vmatpush.msra.mxu0 %v221_v4  ;;  %722 = vmatpush.msra.mxu1 %v221_v4  ;;  %v212_v26 = vld [vmem:[%s816_s7 + $0xd8] sm:$0xff]  ;;  %v205_v27 = vld [vmem:[%s816_s7 + $0xa0] sm:$0xff]  ;;  %v198_v29 = vld [vmem:[%s816_s7 + $0x68] sm:$0xff] }
  0x15   : > { %723 = vmatpush.msra.mxu2 %v221_v4  ;;  %724 = vmatpush.msra.mxu3 %v221_v4  ;;  %v213_v30 = vld [vmem:[%s816_s7 + $0xe0] sm:$0xff]  ;;  %v206_v31 = vld [vmem:[%s816_s7 + $0xa8] sm:$0xff]  ;;  %v191_v32 = vld [vmem:[%s816_s7 + $0x30] sm:$0xff] }
  0x16   : > { %335 = vmatpush.msra.mxu0 %v220_v5  ;;  %725 = vmatpush.msra.mxu1 %v220_v5  ;;  %v199_v33 = vld [vmem:[%s816_s7 + $0x70] sm:$0xff]  ;;  %v214_v34 = vld [vmem:[%s816_s7 + $0xe8] sm:$0xff]  ;;  %v192_v36 = vld [vmem:[%s816_s7 + $0x38] sm:$0xff] }
  0x17   : > { %726 = vmatpush.msra.mxu2 %v220_v5  ;;  %727 = vmatpush.msra.mxu3 %v220_v5  ;;  %v207_v35 = vld [vmem:[%s816_s7 + $0xb0] sm:$0xff]  ;;  %v200_v37 = vld [vmem:[%s816_s7 + $0x78] sm:$0xff] }
  0x18   : > { %336 = vmatpush.msra.mxu0 %v219_v6  ;;  %728 = vmatpush.msra.mxu1 %v219_v6  ;;  %v215_v38 = vld [vmem:[%s816_s7 + $0xf0] sm:$0xff]  ;;  %v208_v39 = vld [vmem:[%s816_s7 + $0xb8] sm:$0xff] }
  0x19   : > { %729 = vmatpush.msra.mxu2 %v219_v6  ;;  %730 = vmatpush.msra.mxu3 %v219_v6  ;;  %v216_v40 = vld [vmem:[%s816_s7 + $0xf8] sm:$0xff] }
  0x1a   : > { %337 = vmatpush.msra.mxu0 %v218_v7  ;;  %731 = vmatpush.msra.mxu1 %v218_v7 }
  0x1b   : > { %732 = vmatpush.msra.mxu2 %v218_v7  ;;  %733 = vmatpush.msra.mxu3 %v218_v7 }
  0x1c   : > { %338 = vmatpush.msra.mxu0 %v217_v8  ;;  %734 = vmatpush.msra.mxu1 %v217_v8 }
  0x1d   : > { %676 = vmatmul.msk.f32.vlgmr.msra.gmra.mxu0 %vm226_vm0, %v185_v9  ;;  %684 = vmatmul.msk.f32.vlgmr.msra.gmra.mxu1 %vm226_vm0, %v193_v10 }
  0x1e   : > { %735 = vmatpush.msra.mxu2 %v217_v8  ;;  %736 = vmatpush.msra.mxu3 %v217_v8 }
  0x1f   : > { %692 = vmatmul.msk.f32.vlgmr.msra.gmra.mxu2 %vm226_vm0, %v201_v11  ;;  %700 = vmatmul.msk.f32.vlgmr.msra.gmra.mxu3 %vm226_vm0, %v209_v15 }
  0x25   : > { %677 = vmatmul.msk.f32.gmra.mxu0 %vm226_vm0, %v186_v12  ;;  %685 = vmatmul.msk.f32.gmra.mxu1 %vm226_vm0, %v194_v13 }
  0x27   : > { %693 = vmatmul.msk.f32.gmra.mxu2 %vm226_vm0, %v202_v14  ;;  %701 = vmatmul.msk.f32.gmra.mxu3 %vm226_vm0, %v210_v19 }
  0x2d   : > { %678 = vmatmul.msk.f32.gmra.mxu0 %vm226_vm0, %v187_v16  ;;  %686 = vmatmul.msk.f32.gmra.mxu1 %vm226_vm0, %v195_v17 }
  0x2f   : > { %694 = vmatmul.msk.f32.gmra.mxu2 %vm226_vm0, %v203_v18  ;;  %702 = vmatmul.msk.f32.gmra.mxu3 %vm226_vm0, %v211_v23 }
  0x35   : > { %679 = vmatmul.msk.f32.gmra.mxu0 %vm226_vm0, %v188_v20  ;;  %687 = vmatmul.msk.f32.gmra.mxu1 %vm226_vm0, %v196_v21 }
  0x37   : > { %695 = vmatmul.msk.f32.gmra.mxu2 %vm226_vm0, %v204_v22  ;;  %703 = vmatmul.msk.f32.gmra.mxu3 %vm226_vm0, %v212_v26 }
  0x3d   : > { %680 = vmatmul.msk.f32.gmra.mxu0 %vm226_vm0, %v189_v24  ;;  %688 = vmatmul.msk.f32.gmra.mxu1 %vm226_vm0, %v197_v25 }
  0x3f   : > { %696 = vmatmul.msk.f32.gmra.mxu2 %vm226_vm0, %v205_v27  ;;  %704 = vmatmul.msk.f32.gmra.mxu3 %vm226_vm0, %v213_v30 }
  0x45   : > { %681 = vmatmul.msk.f32.gmra.mxu0 %vm226_vm0, %v190_v28  ;;  %689 = vmatmul.msk.f32.gmra.mxu1 %vm226_vm0, %v198_v29 }
  0x47   : > { %697 = vmatmul.msk.f32.gmra.mxu2 %vm226_vm0, %v206_v31  ;;  %705 = vmatmul.msk.f32.gmra.mxu3 %vm226_vm0, %v214_v34 }
  0x4d   : > { %682 = vmatmul.msk.f32.gmra.mxu0 %vm226_vm0, %v191_v32  ;;  %690 = vmatmul.msk.f32.gmra.mxu1 %vm226_vm0, %v199_v33 }
  0x4f   : > { %698 = vmatmul.msk.f32.gmra.mxu2 %vm226_vm0, %v207_v35  ;;  %706 = vmatmul.msk.f32.gmra.mxu3 %vm226_vm0, %v215_v38 }
  0x55   : > { %683 = vmatmul.msk.f32.gmra.mxu0 %vm226_vm0, %v192_v36  ;;  %691 = vmatmul.msk.f32.gmra.mxu1 %vm226_vm0, %v200_v37 }
  0x57   : > { %699 = vmatmul.msk.f32.gmra.mxu2 %vm226_vm0, %v208_v39  ;;  %707 = vmatmul.msk.f32.gmra.mxu3 %vm226_vm0, %v216_v40 }
  0x9a   : > { %v340_v41 = vpop.f32.mrf.mxu0  ;;  %v892_v42 = vpop.f32.mrf.mxu1 }
  0x9b   : > { %436 = vst [vmem:[%s890_s14] sm:$0xff] %v340_v41  ;;  %v505_v63 = vmul.f32 %v340_v41, %v340_v41  ;;  %v513_v27 = vmul.f32 %v892_v42, %v892_v42 }
  0x9c   : > { %444 = vst [vmem:[%s890_s14 + $0x40] sm:$0xff] %v892_v42 }
  0xa2   : > { %v343_v43 = vpop.f32.mrf.mxu0  ;;  %v897_v44 = vpop.f32.mrf.mxu1 }
  0xa3   : > { %437 = vst [vmem:[%s890_s14 + $0x8] sm:$0xff] %v343_v43  ;;  %v900_v45 = vpop.f32.mrf.mxu2  ;;  %v911_v49 = vpop.f32.mrf.mxu3  ;;  %v506_v62 = vmul.f32 %v343_v43, %v343_v43  ;;  %v468_v0 = vadd.f32 %v343_v43, %v340_v41  ;;  %v514_v30 = vmul.f32 %v897_v44, %v897_v44 }
  0xa4   : > { %445 = vst [vmem:[%s890_s14 + $0x48] sm:$0xff] %v897_v44 }
  0xa5   : > { %452 = vst [vmem:[%s890_s14 + $0x80] sm:$0xff] %v900_v45  ;;  %v537_v2 = vadd.f32 %v506_v62, %v505_v63 }
  0xa6   : > { %460 = vst [vmem:[%s890_s14 + $0xc0] sm:$0xff] %v911_v49 }
  0xaa   : > { %v346_v46 = vpop.f32.mrf.mxu0  ;;  %v906_v47 = vpop.f32.mrf.mxu1 }
  0xab   : > { %438 = vst [vmem:[%s890_s14 + $0x10] sm:$0xff] %v346_v46  ;;  %v909_v48 = vpop.f32.mrf.mxu2  ;;  %v924_v53 = vpop.f32.mrf.mxu3  ;;  %v507_v1 = vmul.f32 %v346_v46, %v346_v46  ;;  %v469_v3 = vadd.f32 %v468_v0, %v346_v46  ;;  %v515_v33 = vmul.f32 %v906_v47, %v906_v47 }
  0xac   : > { %446 = vst [vmem:[%s890_s14 + $0x50] sm:$0xff] %v906_v47 }
  0xad   : > { %453 = vst [vmem:[%s890_s14 + $0x88] sm:$0xff] %v909_v48  ;;  %v538_v7 = vadd.f32 %v537_v2, %v507_v1  ;;  %v521_v1 = vmul.f32 %v900_v45, %v900_v45 }
  0xae   : > { %461 = vst [vmem:[%s890_s14 + $0xc8] sm:$0xff] %v924_v53 }
  0xb2   : > { %v349_v50 = vpop.f32.mrf.mxu0  ;;  %v919_v51 = vpop.f32.mrf.mxu1 }
  0xb3   : > { %439 = vst [vmem:[%s890_s14 + $0x18] sm:$0xff] %v349_v50  ;;  %v922_v52 = vpop.f32.mrf.mxu2  ;;  %v937_v57 = vpop.f32.mrf.mxu3  ;;  %v508_v4 = vmul.f32 %v349_v50, %v349_v50  ;;  %v470_v8 = vadd.f32 %v469_v3, %v349_v50  ;;  %v516_v36 = vmul.f32 %v919_v51, %v919_v51  ;;  %v522_v3 = vmul.f32 %v909_v48, %v909_v48 }
  0xb4   : > { %447 = vst [vmem:[%s890_s14 + $0x58] sm:$0xff] %v919_v51 }
  0xb5   : > { %454 = vst [vmem:[%s890_s14 + $0x90] sm:$0xff] %v922_v52  ;;  %v539_v12 = vadd.f32 %v538_v7, %v508_v4 }
  0xb6   : > { %462 = vst [vmem:[%s890_s14 + $0xd0] sm:$0xff] %v937_v57 }
  0xba   : > { %v352_v54 = vpop.f32.mrf.mxu0  ;;  %v932_v55 = vpop.f32.mrf.mxu1 }
  0xbb   : > { %440 = vst [vmem:[%s890_s14 + $0x20] sm:$0xff] %v352_v54  ;;  %v935_v56 = vpop.f32.mrf.mxu2  ;;  %v950_v61 = vpop.f32.mrf.mxu3  ;;  %v509_v9 = vmul.f32 %v352_v54, %v352_v54  ;;  %v471_v13 = vadd.f32 %v470_v8, %v352_v54  ;;  %v517_v41 = vmul.f32 %v932_v55, %v932_v55 }
  0xbc   : > { %448 = vst [vmem:[%s890_s14 + $0x60] sm:$0xff] %v932_v55  ;;  %v524_v8 = vmul.f32 %v935_v56, %v935_v56 }
  0xbd   : > { %455 = vst [vmem:[%s890_s14 + $0x98] sm:$0xff] %v935_v56  ;;  %v540_v15 = vadd.f32 %v539_v12, %v509_v9 }
  0xbe   : > { %463 = vst [vmem:[%s890_s14 + $0xd8] sm:$0xff] %v950_v61 }
  0xc2   : > { %v355_v58 = vpop.f32.mrf.mxu0  ;;  %v945_v59 = vpop.f32.mrf.mxu1 }
  0xc3   : > { %441 = vst [vmem:[%s890_s14 + $0x28] sm:$0xff] %v355_v58  ;;  %v948_v60 = vpop.f32.mrf.mxu2  ;;  %v961_v11 = vpop.f32.mrf.mxu3  ;;  %v510_v14 = vmul.f32 %v355_v58, %v355_v58  ;;  %v472_v16 = vadd.f32 %v471_v13, %v355_v58  ;;  %v518_v46 = vmul.f32 %v945_v59, %v945_v59 }
  0xc4   : > { %449 = vst [vmem:[%s890_s14 + $0x68] sm:$0xff] %v945_v59 }
  0xc5   : > { %456 = vst [vmem:[%s890_s14 + $0xa0] sm:$0xff] %v948_v60  ;;  %v541_v18 = vadd.f32 %v540_v15, %v510_v14 }
  0xc6   : > { %464 = vst [vmem:[%s890_s14 + $0xe0] sm:$0xff] %v961_v11 }
  0xca   : > { %v358_v5 = vpop.f32.mrf.mxu0  ;;  %v382_v6 = vpop.f32.mrf.mxu1 }
  0xcb   : > { %442 = vst [vmem:[%s890_s14 + $0x30] sm:$0xff] %v358_v5  ;;  %v959_v10 = vpop.f32.mrf.mxu2  ;;  %v511_v17 = vmul.f32 %v358_v5, %v358_v5  ;;  %v473_v19 = vadd.f32 %v472_v16, %v358_v5  ;;  %v969_v26 = vpop.f32.mrf.mxu3  ;;  %v523_v5 = vmul.f32 %v922_v52, %v922_v52 }
  0xcc   : > { %450 = vst [vmem:[%s890_s14 + $0x70] sm:$0xff] %v382_v6  ;;  %v526_v15 = vmul.f32 %v959_v10, %v959_v10 }
  0xcd   : > { %457 = vst [vmem:[%s890_s14 + $0xa8] sm:$0xff] %v959_v10  ;;  %v542_v22 = vadd.f32 %v541_v18, %v511_v17 }
  0xce   : > { %465 = vst [vmem:[%s890_s14 + $0xe8] sm:$0xff] %v969_v26 }
  0xd2   : > { %v361_v20 = vpop.f32.mrf.mxu0  ;;  %v385_v21 = vpop.f32.mrf.mxu1 }
  0xd3   : > { %443 = vst [vmem:[%s890_s14 + $0x38] sm:$0xff] %v361_v20  ;;  %v474_v23 = vadd.f32 %v473_v19, %v361_v20  ;;  %v512_v24 = vmul.f32 %v361_v20, %v361_v20  ;;  %v406_v25 = vpop.f32.mrf.mxu2  ;;  %v430_v40 = vpop.f32.mrf.mxu3  ;;  %v520_v58 = vmul.f32 %v385_v21, %v385_v21 }
  0xd4   : > { %451 = vst [vmem:[%s890_s14 + $0x78] sm:$0xff] %v385_v21  ;;  %v527_v18 = vmul.f32 %v406_v25, %v406_v25 }
  0xd5   : > { %v475_v28 = vadd.f32 %v474_v23, %v892_v42  ;;  %v543_v29 = vadd.f32 %v542_v22, %v512_v24  ;;  %458 = vst [vmem:[%s890_s14 + $0xb0] sm:$0xff] %v406_v25 }
  0xd6   : > { %466 = vst [vmem:[%s890_s14 + $0xf0] sm:$0xff] %v430_v40 }
  0xd7   : > { %v476_v31 = vadd.f32 %v475_v28, %v897_v44  ;;  %v544_v32 = vadd.f32 %v543_v29, %v513_v27  ;;  %v532_v29 = vmul.f32 %v950_v61, %v950_v61 }
  0xd9   : > { %v477_v34 = vadd.f32 %v476_v31, %v906_v47  ;;  %v545_v35 = vadd.f32 %v544_v32, %v514_v30  ;;  %v533_v31 = vmul.f32 %v961_v11, %v961_v11 }
  0xdb   : > { %v546_v37 = vadd.f32 %v545_v35, %v515_v33  ;;  %v478_v38 = vadd.f32 %v477_v34, %v919_v51  ;;  %v409_v39 = vpop.f32.mrf.mxu2  ;;  %v519_v51 = vmul.f32 %v382_v6, %v382_v6  ;;  %v433_v0 = vpop.f32.mrf.mxu3 }
  0xdc   : > { %459 = vst [vmem:[%s890_s14 + $0xb8] sm:$0xff] %v409_v39  ;;  %v528_v19 = vmul.f32 %v409_v39, %v409_v39 }
  0xdd   : > { %v479_v42 = vadd.f32 %v478_v38, %v932_v55  ;;  %v547_v43 = vadd.f32 %v546_v37, %v516_v36  ;;  %467 = vst [vmem:[%s890_s14 + $0xf8] sm:$0xff] %v433_v0  ;;  %v535_v37 = vmul.f32 %v430_v40, %v430_v40  ;;  %v536_v38 = vmul.f32 %v433_v0, %v433_v0 }
  0xdf   : > { %v480_v44 = vadd.f32 %v479_v42, %v945_v59  ;;  %v548_v47 = vadd.f32 %v547_v43, %v517_v41 }
  0xe1   : > { %v549_v50 = vadd.f32 %v548_v47, %v518_v46  ;;  %v481_v54 = vadd.f32 %v480_v44, %v382_v6 }
  0xe3   : > { %v550_v62 = vadd.f32 %v549_v50, %v519_v51  ;;  %v482_v63 = vadd.f32 %v481_v54, %v385_v21 }
  0xe5   : > { %v483_v55 = vadd.f32 %v482_v63, %v900_v45  ;;  %v551_v2 = vadd.f32 %v550_v62, %v520_v58  ;;  %v525_v45 = vmul.f32 %v948_v60, %v948_v60 }
  0xe7   : > { %v484_v59 = vadd.f32 %v483_v55, %v909_v48  ;;  %v552_v4 = vadd.f32 %v551_v2, %v521_v1 }
  0xe9   : > { %v485_v6 = vadd.f32 %v484_v59, %v922_v52  ;;  %v553_v7 = vadd.f32 %v552_v4, %v522_v3 }
  0xeb   : > { %v554_v9 = vadd.f32 %v553_v7, %v523_v5  ;;  %v486_v12 = vadd.f32 %v485_v6, %v935_v56  ;;  %v529_v56 = vmul.f32 %v911_v49, %v911_v49 }
  0xed   : > { %v487_v13 = vadd.f32 %v486_v12, %v948_v60  ;;  %v555_v14 = vadd.f32 %v554_v9, %v524_v8  ;;  %v530_v60 = vmul.f32 %v924_v53, %v924_v53 }
  0xef   : > { %v488_v48 = vadd.f32 %v487_v13, %v959_v10  ;;  %v556_v16 = vadd.f32 %v555_v14, %v525_v45  ;;  %v531_v10 = vmul.f32 %v937_v57, %v937_v57 }
  0xf1   : > { %v557_v52 = vadd.f32 %v556_v16, %v526_v15  ;;  %v489_v17 = vadd.f32 %v488_v48, %v406_v25 }
  0xf3   : > { %v558_v20 = vadd.f32 %v557_v52, %v527_v18  ;;  %v490_v21 = vadd.f32 %v489_v17, %v409_v39 }
  0xf5   : > { %v491_v22 = vadd.f32 %v490_v21, %v911_v49  ;;  %v559_v23 = vadd.f32 %v558_v20, %v528_v19 }
  0xf7   : > { %v492_v24 = vadd.f32 %v491_v22, %v924_v53  ;;  %v560_v27 = vadd.f32 %v559_v23, %v529_v56 }
  0xf9   : > { %v493_v25 = vadd.f32 %v492_v24, %v937_v57  ;;  %v561_v28 = vadd.f32 %v560_v27, %v530_v60  ;;  %v534_v57 = vmul.f32 %v969_v26, %v969_v26 }
  0xfb   : > { %v562_v30 = vadd.f32 %v561_v28, %v531_v10  ;;  %v494_v49 = vadd.f32 %v493_v25, %v950_v61 }
  0xfd   : > { %v495_v32 = vadd.f32 %v494_v49, %v961_v11  ;;  %v563_v53 = vadd.f32 %v562_v30, %v532_v29 }
  0xff   : > { %v496_v33 = vadd.f32 %v495_v32, %v969_v26  ;;  %v564_v34 = vadd.f32 %v563_v53, %v533_v31 }
 0x101   : > { %v565_v35 = vadd.f32 %v564_v34, %v534_v57  ;;  %v497_v36 = vadd.f32 %v496_v33, %v430_v40 }
 0x103   : > { %v566_v39 = vadd.f32 %v565_v35, %v535_v37  ;;  %v498_v41 = vadd.f32 %v497_v36, %v433_v0 }
 0x105   : > { %v499_v61 = vrot.slane %v498_v41, 4  ;;  %v567_v42 = vadd.f32 %v566_v39, %v536_v38 }
 0x107   : > { %v500_v43 = vadd.f32 %v499_v61, %v498_v41  ;;  %v568_v44 = vrot.slane %v567_v42, 4 }
 0x109   : > { %v501_v11 = vrot.slane %v500_v43, 2  ;;  %v569_v46 = vadd.f32 %v568_v44, %v567_v42 }
 0x10b   : > { %v502_v47 = vadd.f32 %v501_v11, %v500_v43  ;;  %v570_v50 = vrot.slane %v569_v46, 2 }
 0x10d   : > { %v503_v54 = vrot.slane %v502_v47, 1  ;;  %v571_v51 = vadd.f32 %v570_v50, %v569_v46 }
 0x10f   : > { %v572_v26 = vrot.slane %v571_v51, 1  ;;  %v504_v58 = vadd.f32 %v503_v54, %v502_v47 }
 0x111   : > { %v573_v40 = vadd.f32 %v572_v26, %v571_v51 }
 0x113   : > { %v575_v62 = vsel %vm574_vm1, %v504_v58, %v573_v40 }
 0x114   : > { %v577_v63 = vsel %vm576_vm2, %v575_v62, 0.0 }
 0x115   : > { %578 = vst [vmem:[%s184_s18] sm:$0xff] %v577_v63 }
 0x116 PF: > { %s14_s12 = sadd.s32 1, %s751_s12  }
 0x117   : > { %p11_p5 = scmp.ge.s32.totalorder %s14_s12, 4  }
 0x119   :  { %13 = sbr.rel (!%p11_p5) target bundleno = 1 (0x1), region = 70 }

// kernel: decoder_block.5
= control target key start
LH: loop header
LB: loop body
LE: loop exit
PB: predicated region body
PF: predicated region fallthrough
CT: control target
= control target key end

     0   :  { %s527_s18 = smov 0   ;;  %s699_s0 = inlined_call_operand.vmem [shape: f32[512,128], index: 0, kind: input, shape index: {}]   ;;  %s700_s1 = inlined_call_operand.vmem [shape: f32[1,128], index: 1, kind: input, shape index: {}]   ;;  %s701_s2 = inlined_call_operand.vmem [shape: f32[1,128], index: 2, kind: input, shape index: {}]   ;;  %s702_s3 = inlined_call_operand.vmem [shape: f32[1,128], index: 3, kind: input, shape index: {}]   ;;  %s703_s4 = inlined_call_operand.vmem [shape: f32[1,128], index: 4, kind: input, shape index: {}]   ;;  %s704_s5 = inlined_call_operand.vmem [shape: f32[512,128], index: 5, kind: output, shape index: {}]  }
   0x1 LB: > { %s468_s19 = sadd.s32 4294967295, %s495_s18   ;;  %p472_p0 = scmp.ge.s32.totalorder %s495_s18, 1  ;;  %s495_s18 = sphi %s527_s18, %s15_s18  }
   0x2   : > { %p188_p1 = scmp.lt.s32.totalorder %s495_s18, 3 }
   0x4   : > { %p189_p2 = pnand %p472_p0, %p188_p1 }
   0x5   : > { %s473_s22 = sshll.u32 (!%p189_p2), %s468_s19, 5 }
   0x6   : > { %192 = sbr.rel (%p189_p2) target bundleno = 76 (0x4c), region = 40  ;;  %p217_p3 = scmp.lt.s32.totalorder (!%p189_p2), %s473_s22, 63 }
   0xb   : > { %v228_v0 = vld [vmem:[%s701_s2] sm:$0x1]  ;;  %s706_s22 = smov (!%p217_p3, %s473_s22), 63 }
   0xc   : > { %v229_v1 = vadd.f32 1e-05, %v228_v0  ;;  %s474_s23 = sshll.u32 %s706_s22, 3  ;;  %v240_v8 = vld [vmem:[%s702_s3] sm:$0x1] }
   0xd   : > { %s549_s28 = scalar_lea.vmem %s699_s0, %s474_s23  ;;  %v243_v10 = vld [vmem:[%s700_s1] sm:$0x1]  ;;  %s591_s10 = scalar_lea.vmem %s704_s5, %s474_s23 }
   0xe   : > { %487 = vrsqrt.f32 %v229_v1  ;;  %vm236_vm0 = vweird.f32 %v229_v1  ;;  %v242_v12 = vld [vmem:[%s703_s4] sm:$0x1]  ;;  %v247_v14 = vld [vmem:[%s549_s28 + $0x8] sm:$0xff]  ;;  %v248_v15 = vld [vmem:[%s549_s28 + $0x10] sm:$0xff] }
   0xf   : > { %v246_v13 = vld [vmem:[%s549_s28] sm:$0xff]  ;;  %v249_v18 = vld [vmem:[%s549_s28 + $0x18] sm:$0xff]  ;;  %v251_v20 = vld [vmem:[%s549_s28 + $0x28] sm:$0xff] }
  0x10   : > { %v250_v19 = vld [vmem:[%s549_s28 + $0x20] sm:$0xff]  ;;  %v252_v21 = vld [vmem:[%s549_s28 + $0x30] sm:$0xff]  ;;  %v253_v26 = vld [vmem:[%s549_s28 + $0x38] sm:$0xff] }
  0x11   : > { %v254_v27 = vld [vmem:[%s549_s28 + $0x40] sm:$0xff]  ;;  %v255_v33 = vld [vmem:[%s549_s28 + $0x48] sm:$0xff]  ;;  %v256_v34 = vld [vmem:[%s549_s28 + $0x50] sm:$0xff] }
  0x12   : > { %v257_v41 = vld [vmem:[%s549_s28 + $0x58] sm:$0xff]  ;;  %v258_v46 = vld [vmem:[%s549_s28 + $0x60] sm:$0xff]  ;;  %v259_v51 = vld [vmem:[%s549_s28 + $0x68] sm:$0xff] }
  0x13   : > { %v260_v55 = vld [vmem:[%s549_s28 + $0x70] sm:$0xff]  ;;  %v261_v59 = vld [vmem:[%s549_s28 + $0x78] sm:$0xff]  ;;  %v262_v63 = vld [vmem:[%s549_s28 + $0x80] sm:$0xff] }
  0x14   : > { %v488_v2 = vpop.eup %487 }
  0x15   : > { %v231_v3 = vmul.f32 %v488_v2, %v229_v1  ;;  %vm237_vm1 = vweird.f32 %v488_v2 }
  0x16   : > { %vm238_vm2 = vmor %vm236_vm0, %vm237_vm1 }
  0x17   : > { %v232_v4 = vmul.f32 %v488_v2, %v231_v3  ;;  %v263_v3 = vld [vmem:[%s549_s28 + $0x88] sm:$0xff] }
  0x19   : > { %v233_v5 = vmul.f32 0.5, %v232_v4 }
  0x1b   : > { %v234_v6 = vsub.f32 1.5, %v233_v5 }
  0x1d   : > { %v235_v7 = vmul.f32 %v488_v2, %v234_v6 }
  0x1f   : > { %v239_v9 = vsel %vm238_vm2, %v488_v2, %v235_v7  ;;  %v264_v7 = vld [vmem:[%s549_s28 + $0x90] sm:$0xff] }
  0x20   : > { %v241_v11 = vmul.f32 %v240_v8, %v239_v9 }
  0x22   : > { %v244_v16 = vmul.f32 %v243_v10, %v241_v11  ;;  %v560_v17 = vperm.slane %v241_v11, 0  ;;  %v265_v11 = vld [vmem:[%s549_s28 + $0x98] sm:$0xff] }
  0x24   : > { %v245_v22 = vsub.f32 %v242_v12, %v244_v16  ;;  %v281_v23 = vmul.f32 %v560_v17, %v246_v13  ;;  %v282_v24 = vmul.f32 %v560_v17, %v247_v14  ;;  %v283_v25 = vmul.f32 %v560_v17, %v248_v15  ;;  %v266_v15 = vld [vmem:[%s549_s28 + $0xa0] sm:$0xff] }
  0x25   : > { %v284_v28 = vmul.f32 %v560_v17, %v249_v18  ;;  %v285_v29 = vmul.f32 %v560_v17, %v250_v19  ;;  %v286_v30 = vmul.f32 %v560_v17, %v251_v20  ;;  %v287_v32 = vmul.f32 %v560_v17, %v252_v21  ;;  %v267_v20 = vld [vmem:[%s549_s28 + $0xa8] sm:$0xff] }
  0x26   : > { %v574_v31 = vperm.slane %v245_v22, 0  ;;  %v288_v35 = vmul.f32 %v560_v17, %v253_v26  ;;  %v289_v36 = vmul.f32 %v560_v17, %v254_v27  ;;  %v290_v44 = vmul.f32 %v560_v17, %v255_v33  ;;  %v270_v33 = vld [vmem:[%s549_s28 + $0xc0] sm:$0xff] }
  0x27   : > { %v291_v45 = vmul.f32 %v560_v17, %v256_v34  ;;  %v292_v54 = vmul.f32 %v560_v17, %v257_v41  ;;  %v293_v58 = vmul.f32 %v560_v17, %v258_v46  ;;  %v294_v62 = vmul.f32 %v560_v17, %v259_v51  ;;  %v272_v41 = vld [vmem:[%s549_s28 + $0xd0] sm:$0xff] }
  0x28   : > { %v316_v37 = vadd.f32 %v574_v31, %v281_v23  ;;  %v317_v38 = vadd.f32 %v574_v31, %v282_v24  ;;  %v318_v39 = vadd.f32 %v574_v31, %v283_v25  ;;  %v319_v40 = vadd.f32 %v574_v31, %v284_v28  ;;  %v268_v24 = vld [vmem:[%s549_s28 + $0xb0] sm:$0xff]  ;;  %v269_v28 = vld [vmem:[%s549_s28 + $0xb8] sm:$0xff] }
  0x29   : > { %v320_v42 = vadd.f32 %v574_v31, %v285_v29  ;;  %v321_v43 = vadd.f32 %v574_v31, %v286_v30  ;;  %v322_v50 = vadd.f32 %v574_v31, %v287_v32  ;;  %v323_v53 = vadd.f32 %v574_v31, %v288_v35 }
  0x2a   : > { %v348_v47 = vmax.f32 %v316_v37, 0.0  ;;  %v349_v48 = vmax.f32 %v317_v38, 0.0  ;;  %v350_v49 = vmax.f32 %v318_v39, 0.0  ;;  %v351_v52 = vmax.f32 %v319_v40, 0.0  ;;  %v271_v37 = vld [vmem:[%s549_s28 + $0xc8] sm:$0xff] }
  0x2b   : > { %v352_v56 = vmax.f32 %v320_v42, 0.0  ;;  %v324_v57 = vadd.f32 %v574_v31, %v289_v36  ;;  %v353_v60 = vmax.f32 %v321_v43, 0.0  ;;  %v325_v61 = vadd.f32 %v574_v31, %v290_v44 }
  0x2c   : > { %380 = vst [vmem:[%s591_s10] sm:$0xff] %v348_v47  ;;  %v354_v0 = vmax.f32 %v322_v50, 0.0  ;;  %v326_v1 = vadd.f32 %v574_v31, %v291_v45  ;;  %v295_v2 = vmul.f32 %v560_v17, %v260_v55  ;;  %v355_v4 = vmax.f32 %v323_v53, 0.0  ;;  %v273_v45 = vld [vmem:[%s549_s28 + $0xd8] sm:$0xff]  ;;  %v275_v53 = vld [vmem:[%s549_s28 + $0xe8] sm:$0xff] }
  0x2d   : > { %381 = vst [vmem:[%s591_s10 + $0x8] sm:$0xff] %v349_v48  ;;  %v327_v5 = vadd.f32 %v574_v31, %v292_v54  ;;  %v296_v6 = vmul.f32 %v560_v17, %v261_v59  ;;  %v356_v8 = vmax.f32 %v324_v57, 0.0  ;;  %v328_v9 = vadd.f32 %v574_v31, %v293_v58  ;;  %v276_v57 = vld [vmem:[%s549_s28 + $0xf0] sm:$0xff] }
  0x2e   : > { %382 = vst [vmem:[%s591_s10 + $0x10] sm:$0xff] %v350_v49  ;;  %v297_v10 = vmul.f32 %v560_v17, %v262_v63  ;;  %v357_v12 = vmax.f32 %v325_v61, 0.0  ;;  %v329_v13 = vadd.f32 %v574_v31, %v294_v62  ;;  %v298_v14 = vmul.f32 %v560_v17, %v263_v3  ;;  %v274_v49 = vld [vmem:[%s549_s28 + $0xe0] sm:$0xff]  ;;  %v277_v61 = vld [vmem:[%s549_s28 + $0xf8] sm:$0xff] }
  0x2f   : > { %383 = vst [vmem:[%s591_s10 + $0x18] sm:$0xff] %v351_v52  ;;  %v358_v16 = vmax.f32 %v326_v1, 0.0  ;;  %v330_v18 = vadd.f32 %v574_v31, %v295_v2  ;;  %v299_v19 = vmul.f32 %v560_v17, %v264_v7  ;;  %v359_v21 = vmax.f32 %v327_v5, 0.0 }
  0x30   : > { %384 = vst [vmem:[%s591_s10 + $0x20] sm:$0xff] %v352_v56  ;;  %v331_v22 = vadd.f32 %v574_v31, %v296_v6  ;;  %v300_v23 = vmul.f32 %v560_v17, %v265_v11  ;;  %v360_v25 = vmax.f32 %v328_v9, 0.0  ;;  %v332_v26 = vadd.f32 %v574_v31, %v297_v10 }
  0x31   : > { %385 = vst [vmem:[%s591_s10 + $0x28] sm:$0xff] %v353_v60  ;;  %v301_v27 = vmul.f32 %v560_v17, %v266_v15  ;;  %v361_v29 = vmax.f32 %v329_v13, 0.0  ;;  %v333_v30 = vadd.f32 %v574_v31, %v298_v14  ;;  %v302_v32 = vmul.f32 %v560_v17, %v267_v20 }
  0x32   : > { %386 = vst [vmem:[%s591_s10 + $0x30] sm:$0xff] %v354_v0  ;;  %v362_v34 = vmax.f32 %v330_v18, 0.0  ;;  %v334_v35 = vadd.f32 %v574_v31, %v299_v19  ;;  %v303_v36 = vmul.f32 %v560_v17, %v268_v24  ;;  %v363_v38 = vmax.f32 %v331_v22, 0.0 }
  0x33   : > { %387 = vst [vmem:[%s591_s10 + $0x38] sm:$0xff] %v355_v4  ;;  %v335_v39 = vadd.f32 %v574_v31, %v300_v23  ;;  %v304_v40 = vmul.f32 %v560_v17, %v269_v28  ;;  %v364_v42 = vmax.f32 %v332_v26, 0.0  ;;  %v336_v43 = vadd.f32 %v574_v31, %v301_v27 }
  0x34   : > { %388 = vst [vmem:[%s591_s10 + $0x40] sm:$0xff] %v356_v8  ;;  %v305_v44 = vmul.f32 %v560_v17, %v270_v33  ;;  %v365_v46 = vmax.f32 %v333_v30, 0.0  ;;  %v337_v47 = vadd.f32 %v574_v31, %v302_v32  ;;  %v306_v48 = vmul.f32 %v560_v17, %v271_v37 }
  0x35   : > { %389 = vst [vmem:[%s591_s10 + $0x48] sm:$0xff] %v357_v12  ;;  %v366_v50 = vmax.f32 %v334_v35, 0.0  ;;  %v338_v51 = vadd.f32 %v574_v31, %v303_v36  ;;  %v307_v52 = vmul.f32 %v560_v17, %v272_v41  ;;  %v367_v54 = vmax.f32 %v335_v39, 0.0 }
  0x36   : > { %390 = vst [vmem:[%s591_s10 + $0x50] sm:$0xff] %v358_v16  ;;  %v339_v55 = vadd.f32 %v574_v31, %v304_v40  ;;  %v308_v56 = vmul.f32 %v560_v17, %v273_v45  ;;  %v368_v58 = vmax.f32 %v336_v43, 0.0  ;;  %v340_v59 = vadd.f32 %v574_v31, %v305_v44 }
  0x37   : > { %391 = vst [vmem:[%s591_s10 + $0x58] sm:$0xff] %v359_v21  ;;  %v309_v60 = vmul.f32 %v560_v17, %v274_v49  ;;  %v369_v62 = vmax.f32 %v337_v47, 0.0  ;;  %v341_v63 = vadd.f32 %v574_v31, %v306_v48  ;;  %v310_v0 = vmul.f32 %v560_v17, %v275_v53 }
  0x38   : > { %392 = vst [vmem:[%s591_s10 + $0x60] sm:$0xff] %v360_v25  ;;  %v370_v1 = vmax.f32 %v338_v51, 0.0  ;;  %v342_v2 = vadd.f32 %v574_v31, %v307_v52  ;;  %v311_v3 = vmul.f32 %v560_v17, %v276_v57  ;;  %v371_v4 = vmax.f32 %v339_v55, 0.0 }
  0x39   : > { %393 = vst [vmem:[%s591_s10 + $0x68] sm:$0xff] %v361_v29  ;;  %v343_v5 = vadd.f32 %v574_v31, %v308_v56  ;;  %v312_v6 = vmul.f32 %v560_v17, %v277_v61  ;;  %v372_v7 = vmax.f32 %v340_v59, 0.0  ;;  %v344_v8 = vadd.f32 %v574_v31, %v309_v60 }
  0x3a   : > { %394 = vst [vmem:[%s591_s10 + $0x70] sm:$0xff] %v362_v34  ;;  %v373_v9 = vmax.f32 %v341_v63, 0.0  ;;  %v345_v10 = vadd.f32 %v574_v31, %v310_v0  ;;  %v374_v11 = vmax.f32 %v342_v2, 0.0  ;;  %v346_v12 = vadd.f32 %v574_v31, %v311_v3 }
  0x3b   : > { %395 = vst [vmem:[%s591_s10 + $0x78] sm:$0xff] %v363_v38  ;;  %v375_v17 = vmax.f32 %v343_v5, 0.0  ;;  %v347_v13 = vadd.f32 %v574_v31, %v312_v6  ;;  %v376_v14 = vmax.f32 %v344_v8, 0.0 }
  0x3c   : > { %396 = vst [vmem:[%s591_s10 + $0x80] sm:$0xff] %v364_v42  ;;  %v377_v15 = vmax.f32 %v345_v10, 0.0  ;;  %v378_v16 = vmax.f32 %v346_v12, 0.0 }
  0x3d   : > { %397 = vst [vmem:[%s591_s10 + $0x88] sm:$0xff] %v365_v46  ;;  %v379_v18 = vmax.f32 %v347_v13, 0.0 }
  0x3e   : > { %398 = vst [vmem:[%s591_s10 + $0x90] sm:$0xff] %v366_v50 }
  0x3f   : > { %399 = vst [vmem:[%s591_s10 + $0x98] sm:$0xff] %v367_v54 }
  0x40   : > { %400 = vst [vmem:[%s591_s10 + $0xa0] sm:$0xff] %v368_v58 }
  0x41   : > { %401 = vst [vmem:[%s591_s10 + $0xa8] sm:$0xff] %v369_v62 }
  0x42   : > { %402 = vst [vmem:[%s591_s10 + $0xb0] sm:$0xff] %v370_v1 }
  0x43   : > { %403 = vst [vmem:[%s591_s10 + $0xb8] sm:$0xff] %v371_v4 }
  0x44   : > { %404 = vst [vmem:[%s591_s10 + $0xc0] sm:$0xff] %v372_v7 }
  0x45   : > { %405 = vst [vmem:[%s591_s10 + $0xc8] sm:$0xff] %v373_v9 }
  0x46   : > { %406 = vst [vmem:[%s591_s10 + $0xd0] sm:$0xff] %v374_v11 }
  0x47   : > { %407 = vst [vmem:[%s591_s10 + $0xd8] sm:$0xff] %v375_v17 }
  0x48   : > { %408 = vst [vmem:[%s591_s10 + $0xe0] sm:$0xff] %v376_v14 }
  0x49   : > { %409 = vst [vmem:[%s591_s10 + $0xe8] sm:$0xff] %v377_v15 }
  0x4a   : > { %410 = vst [vmem:[%s591_s10 + $0xf0] sm:$0xff] %v378_v16 }
  0x4b   : > { %411 = vst [vmem:[%s591_s10 + $0xf8] sm:$0xff] %v379_v18 }
  0x4c PF: > { %s15_s18 = sadd.s32 1, %s495_s18  }
  0x4d   : > { %p12_p4 = scmp.ge.s32.totalorder %s15_s18, 4  }
  0x4f   :  { %14 = sbr.rel (!%p12_p4) target bundleno = 1 (0x1), region = 70 }

</bundles_post_ra>
